<compile_context>
chip_gen: v6e
topology: v6e:2x2x1
jax: 0.10.0
libtpu: 0.0.40
codegen_flags: <defaults>
</compile_context>

<pallas_src>
import functools
import math

import jax
import jax.numpy as jnp
from jax.experimental import pallas as pl
from jax.experimental.pallas import tpu as pltpu


# ----------------------------------------------------------------------------
# Pallas kernel: per-step patch-embedding matmul (+ fused pos-embed/bias add)
# ----------------------------------------------------------------------------
def _patch_embed_kernel(x_ref, w_ref, pe_ref, o_ref):
    # x_ref:  (bb, T, K)      bf16 token matrix; row 0 of each batch is zeros (cls)
    # w_ref:  (K, E_pad)      bf16 flattened conv weight
    # pe_ref: (T, E_pad)      f32  pos-embed (+bias folded on patch rows, +cls on row 0)
    # o_ref:  (bb, T, E_pad)  f32
    w = w_ref[...]
    pe = pe_ref[...]
    bb = x_ref.shape[0]
    # Static unroll over the bb batch elements handled by this grid step:
    # amortizes grid-step overhead while keeping clean 2-D MXU matmuls.
    for i in range(bb):
        acc = jnp.dot(x_ref[i], w, preferred_element_type=jnp.float32)  # (T, E_pad)
        o_ref[i] = (acc + pe).astype(o_ref.dtype)


def _pick_batch_block(B):
    """Batch elements per grid step: amortize step overhead, keep >=2 steps."""
    for bb in (8, 4, 2):
        if B % bb == 0 and B // bb >= 2:
            return bb
    return 1


# ----------------------------------------------------------------------------
# One-time parameter preparation (hoisted out of the forward pass)
# ----------------------------------------------------------------------------
def prepare_params(weight, bias, cls_token, pos_embed):
    """Flatten/transpose/pad the conv weight and fold bias & cls into pos-embed.

    weight:    (E, C, ph, pw)
    bias:      (E,)
    cls_token: (1, 1, E)
    pos_embed: (1, P+1, E)
    returns:   w_pad (K, E_pad) bf16, pe_pad (P+1, E_pad) f32
    """
    E, C, ph, pw = weight.shape
    K = C * ph * pw
    P = pos_embed.shape[1] - 1
    E_pad = ((E + 127) // 128) * 128

    w_flat = jnp.transpose(weight.reshape(E, K)).astype(jnp.bfloat16)       # (K, E)
    # Row 0: cls_token + pos_embed[0]; rows 1..P: bias + pos_embed[1+p].
    addend = jnp.concatenate(
        [cls_token[0].astype(jnp.float32),
         jnp.broadcast_to(bias.astype(jnp.float32)[None, :], (P, E))], axis=0)
    pe_all = pos_embed[0].astype(jnp.float32) + addend                      # (P+1, E)

    if E_pad != E:
        w_flat = jnp.pad(w_flat, ((0, 0), (0, E_pad - E)))
        pe_all = jnp.pad(pe_all, ((0, 0), (0, E_pad - E)))
    return w_flat, pe_all


# ----------------------------------------------------------------------------
# Forward pass (matches VanillaPatchEmbedding.forward with flatten=True)
# ----------------------------------------------------------------------------
@functools.partial(jax.jit, static_argnames=("patch_size", "embed_size"))
def patch_embed_forward(x, w_pad, pe_pad, *, patch_size, embed_size):
    """x: (B, C, H, W) f32 NCHW.  Returns (B, P+1, E) f32."""
    B, C, H, W = x.shape
    ph, pw = patch_size
    gh, gw = H // ph, W // pw
    P = gh * gw
    T = P + 1
    K = C * ph * pw
    E_pad = w_pad.shape[1]

    # Unfold NCHW -> (B, P, K) patch matrix (K ordered (C, ph, pw) to match the
    # flattened conv weight), cast to bf16 (halves the materialized copy), and
    # prepend one ZERO "cls" token row per batch so the kernel writes the full
    # (P+1)-token output directly (no concatenate over the output afterwards).
    xp = x.reshape(B, C, gh, ph, gw, pw)
    xp = jnp.transpose(xp, (0, 2, 4, 1, 3, 5)).reshape(B, P, K)
    xt = jnp.pad(xp.astype(jnp.bfloat16), ((0, 0), (1, 0), (0, 0)))          # (B, T, K)
    # TODO(synk): for very large images the unfold could be moved fully inside
    # the kernel (DMA image slabs + VMEM rearrange) to avoid this HBM copy.

    bb = _pick_batch_block(B)

    out = pl.pallas_call(
        _patch_embed_kernel,
        out_shape=jax.ShapeDtypeStruct((B, T, E_pad), jnp.float32),
        grid_spec=pltpu.PrefetchScalarGridSpec(
            num_scalar_prefetch=0,
            grid=(B // bb,),
            in_specs=[
                pl.BlockSpec((bb, T, K), lambda g: (g, 0, 0)),      # tokens
                pl.BlockSpec((K, E_pad), lambda g: (0, 0)),         # weight (resident)
                pl.BlockSpec((T, E_pad), lambda g: (0, 0)),         # pos-embed (+bias/cls)
            ],
            out_specs=pl.BlockSpec((bb, T, E_pad), lambda g: (g, 0, 0)),
        ),
        compiler_params=pltpu.CompilerParams(
            dimension_semantics=("parallel",),
            vmem_limit_bytes=32 * 1024 * 1024,
        ),
    )(xt, w_pad, pe_pad)

    if E_pad != embed_size:
        out = out[..., :embed_size]
    return out


# ----------------------------------------------------------------------------
# Deterministic parameter init (mimics module __init__ shapes & init scheme)
# ----------------------------------------------------------------------------
def init_params(key, img_size, patch_size, in_chans, embed_size, dtype=jnp.float32):
    ph, pw = patch_size
    gh, gw = img_size[0] // ph, img_size[1] // pw
    num_patches = gh * gw
    fan_in = in_chans * ph * pw

    k_w, k_b = jax.random.split(key)

    # kaiming uniform (a=sqrt(5)) on weight: bound = sqrt(1/fan_in)
    w_bound = math.sqrt(1.0 / fan_in)
    weight = jax.random.uniform(k_w, (embed_size, in_chans, ph, pw),
                                dtype=dtype, minval=-w_bound, maxval=w_bound)

    # xavier-style uniform on bias using fan_in only
    b_bound = math.sqrt(6.0 / fan_in)
    bias = jax.random.uniform(k_b, (embed_size,), dtype=dtype,
                              minval=-b_bound, maxval=b_bound)

    cls_token = jnp.zeros((1, 1, embed_size), dtype=dtype)
    pos_embed = jnp.zeros((1, num_patches + 1, embed_size), dtype=dtype)
    return weight, bias, cls_token, pos_embed


# ----------------------------------------------------------------------------
# Pure-JAX reference (strided conv) for correctness check
# ----------------------------------------------------------------------------
def reference_forward(x, weight, bias, cls_token, pos_embed, patch_size):
    out = jax.lax.conv_general_dilated(
        x, weight, window_strides=patch_size, padding="VALID",
        dimension_numbers=("NCHW", "OIHW", "NCHW"))
    out = out + bias[None, :, None, None]
    B, E, gh, gw = out.shape
    out = out.reshape(B, E, gh * gw).transpose(0, 2, 1)         # (B, P, E)
    cls = jnp.broadcast_to(cls_token, (B, 1, E))
    out = jnp.concatenate([cls, out], axis=1)
    return out + pos_embed


if __name__ == "__main__":
    # Small shapes consistent with the module
    B, C, H, W = 2, 4, 16, 16
    patch = (4, 4)
    embed = 32

    key = jax.random.PRNGKey(0)
    k_x, k_p, k_pe = jax.random.split(key, 3)

    x = jax.random.normal(k_x, (B, C, H, W), dtype=jnp.float32)
    weight, bias, cls_token, pos_embed = init_params(k_p, (H, W), patch, C, embed)
    # give pos_embed nonzero values so the add path is actually exercised
    pos_embed = 0.01 * jax.random.normal(k_pe, pos_embed.shape, dtype=jnp.float32)

    # One-time parameter prep (weight flatten/transpose/pad, bias & cls folding).
    w_pad, pe_pad = prepare_params(weight, bias, cls_token, pos_embed)
    w_pad = jax.block_until_ready(w_pad)
    pe_pad = jax.block_until_ready(pe_pad)

    out = patch_embed_forward(x, w_pad, pe_pad, patch_size=patch, embed_size=embed)
    out = jax.block_until_ready(out)

    ref = reference_forward(x, weight, bias, cls_token, pos_embed, patch)
    assert out.shape == (B, (H // patch[0]) * (W // patch[1]) + 1, embed)
    # bf16 matmul inputs (f32 accumulation) -> slightly looser tolerance.
    assert jnp.allclose(out, ref, atol=2e-2, rtol=2e-2), "mismatch vs reference"

    print("KERNEL_OK")
</pallas_src>

<mosaic_0001>
module attributes {stable_mosaic.version = 11 : i64} {
  func.func @_patch_embed_kernel(%arg0: i32, %arg1: memref<1x17x64xbf16, #tpu.memory_space<vmem>>, %arg2: memref<64x128xbf16, #tpu.memory_space<vmem>>, %arg3: memref<17x128xf32, #tpu.memory_space<vmem>>, %arg4: memref<1x17x128xf32, #tpu.memory_space<vmem>>) attributes {dimension_semantics = [#tpu.dimension_semantics<parallel>], iteration_bounds = array<i64: 2>, scalar_prefetch = 0 : i64, scratch_operands = 0 : i64, tpu.core_type = #tpu.core_type<tc>, window_params = [{transform_indices = @transform_0, window_bounds = array<i64: 1, 17, 64>}, {pipeline_mode = #tpu.pipeline_mode<synchronous>, transform_indices = @transform_1, window_bounds = array<i64: 64, 128>}, {pipeline_mode = #tpu.pipeline_mode<synchronous>, transform_indices = @transform_2, window_bounds = array<i64: 17, 128>}, {transform_indices = @transform_3, window_bounds = array<i64: 1, 17, 128>}]} {
    %c0 = arith.constant 0 : index
    %c0_0 = arith.constant 0 : index
    %0 = vector.load %arg2[%c0, %c0_0] : memref<64x128xbf16, #tpu.memory_space<vmem>>, vector<64x128xbf16>
    %c0_1 = arith.constant 0 : index
    %c0_2 = arith.constant 0 : index
    %1 = vector.load %arg3[%c0_1, %c0_2] : memref<17x128xf32, #tpu.memory_space<vmem>>, vector<17x128xf32>
    %c0_3 = arith.constant 0 : index
    %c0_4 = arith.constant 0 : index
    %c0_5 = arith.constant 0 : index
    %2 = vector.load %arg1[%c0_3, %c0_4, %c0_5] : memref<1x17x64xbf16, #tpu.memory_space<vmem>>, vector<1x17x64xbf16>
    %3 = vector.shape_cast %2 : vector<1x17x64xbf16> to vector<17x64xbf16>
    %cst = arith.constant dense<0.000000e+00> : vector<17x128xf32>
    %4 = tpu.matmul %3, %0, %cst {dimension_numbers = #tpu.dot_dimension_numbers<[1], [0], [0], [1], [0, 0, 1, 1], [], []>} : vector<17x64xbf16>, vector<64x128xbf16>, vector<17x128xf32> -> vector<17x128xf32>
    %5 = arith.addf %4, %1 : vector<17x128xf32>
    %c0_6 = arith.constant 0 : index
    %c0_7 = arith.constant 0 : index
    %c0_8 = arith.constant 0 : index
    %6 = vector.load %arg4[%c0_6, %c0_7, %c0_8] : memref<1x17x128xf32, #tpu.memory_space<vmem>>, vector<1x17x128xf32>
    %7 = vector.shape_cast %6 : vector<1x17x128xf32> to vector<17x128xf32>
    %8 = vector.shape_cast %5 : vector<17x128xf32> to vector<1x17x128xf32>
    tpu.vector_store %arg4[%c0_6, %c0_7, %c0_8], %8 {strides = array<i32>} : memref<1x17x128xf32, #tpu.memory_space<vmem>>, vector<1x17x128xf32>,
    return
  }
  func.func @transform_0(%arg0: i32) -> (i32, i32, i32) {
    %c0_i32 = arith.constant 0 : i32
    %c0_i32_0 = arith.constant 0 : i32
    %c0_i32_1 = arith.constant 0 : i32
    return %arg0, %c0_i32, %c0_i32_0 : i32, i32, i32
  }
  func.func @transform_1(%arg0: i32) -> (i32, i32) {
    %c0_i32 = arith.constant 0 : i32
    %c0_i32_0 = arith.constant 0 : i32
    %c0_i32_1 = arith.constant 0 : i32
    return %c0_i32, %c0_i32_0 : i32, i32
  }
  func.func @transform_2(%arg0: i32) -> (i32, i32) {
    %c0_i32 = arith.constant 0 : i32
    %c0_i32_0 = arith.constant 0 : i32
    %c0_i32_1 = arith.constant 0 : i32
    return %c0_i32, %c0_i32_0 : i32, i32
  }
  func.func @transform_3(%arg0: i32) -> (i32, i32, i32) {
    %c0_i32 = arith.constant 0 : i32
    %c0_i32_0 = arith.constant 0 : i32
    %c0_i32_1 = arith.constant 0 : i32
    return %arg0, %c0_i32, %c0_i32_0 : i32, i32, i32
  }
}

</mosaic_0001>

<bundles_post_ra>
// kernel: patch_embed_forward.1
= control target key start
LH: loop header
LB: loop body
LE: loop exit
PB: predicated region body
PF: predicated region fallthrough
CT: control target
= control target key end

     0   :  { %s410_s12 = smov 0   ;;  %s448_s0 = inlined_call_operand.vmem [shape: bf16[2,17,64], index: 0, kind: input, shape index: {}]   ;;  %s449_s1 = inlined_call_operand.vmem [shape: bf16[64,128], index: 1, kind: input, shape index: {}]   ;;  %s450_s2 = inlined_call_operand.vmem [shape: f32[17,128], index: 2, kind: input, shape index: {}]   ;;  %s451_s3 = inlined_call_operand.vmem [shape: f32[2,17,128], index: 3, kind: output, shape index: {}]  }
   0x1 LB: > { %s331_s13 = sadd.s32 4294967295, %s388_s12   ;;  %p335_p0 = scmp.ge.s32.totalorder %s388_s12, 1  ;;  %s388_s12 = sphi %s410_s12, %s13_s12  }
   0x2   : > { %p137_p1 = scmp.lt.s32.totalorder %s388_s12, 3 }
   0x4   : > { %p138_p2 = pnand %p335_p0, %p137_p1 }
   0x5   : > { %p161_p3 = scmp.lt.s32.totalorder (!%p138_p2), %s331_s13, 1 }
   0x6   : > { %141 = sbr.rel (%p138_p2) target bundleno = 230 (0xe6), region = 32 }
   0xb   : > { %v376_v0 = vld [vmem:[%s449_s1 + $0x18] sm:$0xff]   ;;  %v377_v1 = vld [vmem:[%s449_s1 + $0x10] sm:$0xff]   ;;  %s453_s13 = smov (!%p161_p3, %s331_s13), 1  ;;  %v378_v2 = vld [vmem:[%s449_s1 + $0x8] sm:$0xff]   ;;  %vm218_vm0 = vcmask 523264  }
   0xc   : > { %354 = vmatprep.subr.bf16.mxu0 %v376_v0  ;;  %s366_s20 = smul.u32 12, %s453_s13  ;;  %v379_v3 = vld [vmem:[%s449_s1] sm:$0xff]   ;;  %v182_v6 = vld [vmem:[%s450_s2 + $0x10] sm:$0x1]  ;;  %v181_v13 = vld [vmem:[%s450_s2 + $0x8] sm:$0xff] }
   0xd   : > { %355 = vmatpush3.bf16.msra.mxu0 %v376_v0  ;;  %s367_s26 = smul.u32 24, %s453_s13  ;;  %v180_v8 = vld [vmem:[%s450_s2] sm:$0xff] }
   0xe   : > { %356 = vmatprep.subr.bf16.mxu0 %v377_v1  ;;  %s165_s23 = scalar_lea.vmem %s448_s0, %s366_s20 }
   0xf   : > { %v380_v4 = vld [vmem:[%s165_s23] sm:$0xff]   ;;  %v381_v5 = vld [vmem:[%s165_s23 + $0x8] ss:$0 sps:$4 sm:$0x11]   ;;  %s170_s4 = scalar_lea.vmem %s451_s3, %s367_s26 }
  0x10   : > { %362 = vmatprep.mubr.msk.bf16.mxu0 %vm218_vm0, %v380_v4 }
  0x11   : > { %357 = vmatpush3.bf16.msra.mxu0 %v377_v1 }
  0x12   : > { %358 = vmatprep.subr.bf16.mxu0 %v378_v2 }
  0x15   : > { %359 = vmatpush3.bf16.msra.mxu0 %v378_v2 }
  0x16   : > { %360 = vmatprep.subr.bf16.mxu0 %v379_v3 }
  0x19   : > { %361 = vmatpush3.bf16.msra.mxu0 %v379_v3 }
  0x1c   : > { %363 = vmatmul.mubr.msk.bf16.vlgmr.msra.gmra.mxu0 %vm218_vm0, %v381_v5 }
  0xdc   : > { %v364_v7 = vpop.f32.mrf.mxu0 }
  0xdd   : > { %v268_v9 = vadd.f32 %v364_v7, %v182_v6 }
  0xde   : > { %v259_v10 = vpop.f32.mrf.mxu0 }
  0xdf   : > { %275 = vst [vmem:[%s170_s4 + $0x10] sm:$0x1] %v268_v9  ;;  %v260_v11 = vadd.f32 %v259_v10, %v180_v8 }
  0xe0   : > { %v365_v12 = vpop.f32.mrf.mxu0 }
  0xe1   : > { %273 = vst [vmem:[%s170_s4] sm:$0xff] %v260_v11 }
  0xe2   : > { %v262_v14 = vpop.f32.mrf.mxu0 }
  0xe3   : > { %v263_v15 = vadd.f32 %v262_v14, %v181_v13 }
  0xe5   : > { %274 = vst [vmem:[%s170_s4 + $0x8] sm:$0xff] %v263_v15 }
  0xe6 PF: > { %s13_s12 = sadd.s32 1, %s388_s12  }
  0xe7   : > { %p10_p4 = scmp.ge.s32.totalorder %s13_s12, 4  }
  0xe9   :  { %12 = sbr.rel (!%p10_p4) target bundleno = 1 (0x1), region = 62 }

</bundles_post_ra>
